<compile_context>
chip_gen: v6e
topology: v6e:2x2x1
jax: 0.10.0
libtpu: 0.0.40
codegen_flags: <defaults>
</compile_context>

<pallas_src>
import jax
import jax.numpy as jnp
from jax import lax
from jax.experimental import pallas as pl
from jax.experimental.pallas import tpu as pltpu


def _round_up(x, m):
    return (x + m - 1) // m * m


def _tile_plan(n):
    # TN: multiple of 8 (sublane), capped at 512 rows.  >=256 keeps the
    # 256-deep MXU on v6e/v7x busy for large N; toy shapes just use N.
    tn = min(512, _round_up(max(n, 8), 8))
    n_pad = _round_up(n, tn)
    return tn, n_pad


def _vmem_limit_bytes(tn, v):
    # Double-buffered per-step tiles (logits, per-row loss, idx, tgt) plus the
    # resident (V, V) table (also double-buffered by BlockSpec) + headroom.
    tile = 2 * (tn * v * 4 + tn * 4 + 2 * tn * 4)
    table = 2 * v * v * 4
    need = 4 * (tile + table)
    return int(min(max(need, 8 << 20), 48 << 20))


def _fused_kernel(idx_ref, tgt_ref, emb_ref, logits_ref, loss_ref):
    """Embedding lookup + per-row cross-entropy for one (TN, V) tile."""
    tn, v = logits_ref.shape
    # Shared (TN, V) column iota — built once, reused for one-hot and pick.
    col = lax.broadcasted_iota(jnp.int32, (tn, v), 1)

    idx = idx_ref[...]                                        # (TN, 1) int32
    onehot = (col == idx).astype(jnp.float32)                 # (TN, V)
    # Embedding gather as one-hot @ table on the MXU, f32 accumulation.
    logits = jnp.dot(onehot, emb_ref[...],
                     preferred_element_type=jnp.float32)      # (TN, V)
    logits_ref[...] = logits

    # Cross-entropy on the same vregs (no HBM round trip of logits).
    tgt = tgt_ref[...]                                        # (TN, 1) int32
    m = jnp.max(logits, axis=-1, keepdims=True)               # (TN, 1)
    lse = m + jnp.log(jnp.sum(jnp.exp(logits - m), axis=-1, keepdims=True))
    picked = jnp.sum(jnp.where(col == tgt, logits, 0.0),
                     axis=-1, keepdims=True)                  # (TN, 1)
    loss_ref[...] = lse - picked                              # per-row NLL


def _embed_kernel(idx_ref, emb_ref, logits_ref):
    """Embedding lookup only (inference path, target is None)."""
    tn, v = logits_ref.shape
    col = lax.broadcasted_iota(jnp.int32, (tn, v), 1)
    onehot = (col == idx_ref[...]).astype(jnp.float32)
    logits_ref[...] = jnp.dot(onehot, emb_ref[...],
                              preferred_element_type=jnp.float32)


@jax.jit
def _forward_with_target(idx, target, emb):
    b, t = idx.shape
    v = emb.shape[0]
    n = b * t
    tn, n_pad = _tile_plan(n)
    grid = (n_pad // tn,)

    idx_flat = idx.reshape(n, 1).astype(jnp.int32)
    tgt_flat = target.reshape(n, 1).astype(jnp.int32)
    if n_pad != n:
        pad = ((0, n_pad - n), (0, 0))
        idx_flat = jnp.pad(idx_flat, pad)       # pad with token 0 (valid row)
        tgt_flat = jnp.pad(tgt_flat, pad)

    logits, per_row = pl.pallas_call(
        _fused_kernel,
        out_shape=(jax.ShapeDtypeStruct((n_pad, v), jnp.float32),
                   jax.ShapeDtypeStruct((n_pad, 1), jnp.float32)),
        grid=grid,
        in_specs=[
            pl.BlockSpec((tn, 1), lambda i: (i, 0)),
            pl.BlockSpec((tn, 1), lambda i: (i, 0)),
            pl.BlockSpec((v, v), lambda i: (0, 0)),   # table stays resident
        ],
        out_specs=(
            pl.BlockSpec((tn, v), lambda i: (i, 0)),
            pl.BlockSpec((tn, 1), lambda i: (i, 0)),
        ),
        compiler_params=pltpu.CompilerParams(
            dimension_semantics=("parallel",),
            vmem_limit_bytes=_vmem_limit_bytes(tn, v)),
    )(idx_flat, tgt_flat, emb)

    # Mean over the N valid rows (padded rows are sliced away).
    # TODO(synk): F.cross_entropy's ignore_index=-100 default is not handled.
    loss = jnp.sum(per_row[:n, 0]) / jnp.float32(n)
    # PyTorch returns the reshaped (B*T, C) logits when target is given.
    return logits[:n], loss


@jax.jit
def _forward_no_target(idx, emb):
    b, t = idx.shape
    v = emb.shape[0]
    n = b * t
    tn, n_pad = _tile_plan(n)
    grid = (n_pad // tn,)

    idx_flat = idx.reshape(n, 1).astype(jnp.int32)
    if n_pad != n:
        idx_flat = jnp.pad(idx_flat, ((0, n_pad - n), (0, 0)))

    logits = pl.pallas_call(
        _embed_kernel,
        out_shape=jax.ShapeDtypeStruct((n_pad, v), jnp.float32),
        grid=grid,
        in_specs=[
            pl.BlockSpec((tn, 1), lambda i: (i, 0)),
            pl.BlockSpec((v, v), lambda i: (0, 0)),
        ],
        out_specs=pl.BlockSpec((tn, v), lambda i: (i, 0)),
        compiler_params=pltpu.CompilerParams(
            dimension_semantics=("parallel",),
            vmem_limit_bytes=_vmem_limit_bytes(tn, v)),
    )(idx_flat, emb)
    return logits[:n].reshape(b, t, v)


def bigram_forward(idx, emb, target=None):
    """Mirrors BigramLanguageModel.forward(idx, target)."""
    if target is None:
        return _forward_no_target(idx, emb), None
    return _forward_with_target(idx, target, emb)


# TODO(synk): `generate` uses torch.multinomial sampling inside a host-side
# Python loop; that control flow is not implemented as a kernel.


if __name__ == "__main__":
    VOCAB = 128   # vocab size (embedding table is VOCAB x VOCAB)
    B, T = 2, 8

    key = jax.random.PRNGKey(0)
    k_emb, k_idx, k_tgt = jax.random.split(key, 3)

    # nn.Embedding default init: N(0, 1)
    emb = jax.random.normal(k_emb, (VOCAB, VOCAB), dtype=jnp.float32)
    idx = jax.random.randint(k_idx, (B, T), 0, VOCAB, dtype=jnp.int32)
    target = jax.random.randint(k_tgt, (B, T), 0, VOCAB, dtype=jnp.int32)

    # Training path: fused kernel -> (B*T, V) logits + scalar loss.
    logits, loss = bigram_forward(idx, emb, target)
    logits = jax.block_until_ready(logits)
    loss = jax.block_until_ready(loss)

    # Inference path: embedding only -> (B, T, V) logits, loss None.
    logits_nt, loss_nt = bigram_forward(idx, emb)
    logits_nt = jax.block_until_ready(logits_nt)
    assert loss_nt is None

    # Reference check in plain JAX.
    ref_logits = emb[idx.reshape(-1)]                               # (N, V)
    ref_lse = jax.scipy.special.logsumexp(ref_logits, axis=-1)
    ref_picked = jnp.take_along_axis(
        ref_logits, target.reshape(-1, 1), axis=-1)[:, 0]
    ref_loss = jnp.mean(ref_lse - ref_picked)

    assert logits.shape == (B * T, VOCAB)
    assert logits_nt.shape == (B, T, VOCAB)
    assert jnp.allclose(logits, ref_logits, atol=1e-5, rtol=1e-5)
    assert jnp.allclose(logits_nt.reshape(B * T, VOCAB), ref_logits,
                        atol=1e-5, rtol=1e-5)
    assert jnp.allclose(loss, ref_loss, atol=1e-5, rtol=1e-5)

    print("KERNEL_OK")
</pallas_src>

<mosaic_0001>
module attributes {stable_mosaic.version = 11 : i64} {
  func.func @_fused_kernel(%arg0: i32, %arg1: memref<16x1xi32, #tpu.memory_space<vmem>>, %arg2: memref<16x1xi32, #tpu.memory_space<vmem>>, %arg3: memref<128x128xf32, #tpu.memory_space<vmem>>, %arg4: memref<16x128xf32, #tpu.memory_space<vmem>>, %arg5: memref<16x1xf32, #tpu.memory_space<vmem>>) attributes {dimension_semantics = [#tpu.dimension_semantics<parallel>], iteration_bounds = array<i64: 1>, scalar_prefetch = 0 : i64, scratch_operands = 0 : i64, tpu.core_type = #tpu.core_type<tc>, window_params = [{transform_indices = @transform_0, window_bounds = array<i64: 16, 1>}, {transform_indices = @transform_1, window_bounds = array<i64: 16, 1>}, {pipeline_mode = #tpu.pipeline_mode<synchronous>, transform_indices = @transform_2, window_bounds = array<i64: 128, 128>}, {transform_indices = @transform_3, window_bounds = array<i64: 16, 128>}, {transform_indices = @transform_4, window_bounds = array<i64: 16, 1>}]} {
    %0 = tpu.iota {dimensions = array<i32: 1>} : vector<16x128xi32>
    %c0 = arith.constant 0 : index
    %c0_0 = arith.constant 0 : index
    %1 = vector.load %arg1[%c0, %c0_0] : memref<16x1xi32, #tpu.memory_space<vmem>>, vector<16x1xi32>
    %2 = vector.broadcast %1 : vector<16x1xi32> to vector<16x128xi32>
    %3 = arith.cmpi eq, %0, %2 : vector<16x128xi32>
    %4 = arith.extui %3 : vector<16x128xi1> to vector<16x128xi32>
    %5 = arith.sitofp %4 : vector<16x128xi32> to vector<16x128xf32>
    %c0_1 = arith.constant 0 : index
    %c0_2 = arith.constant 0 : index
    %6 = vector.load %arg3[%c0_1, %c0_2] : memref<128x128xf32, #tpu.memory_space<vmem>>, vector<128x128xf32>
    %cst = arith.constant dense<0.000000e+00> : vector<16x128xf32>
    %7 = tpu.matmul %5, %6, %cst {dimension_numbers = #tpu.dot_dimension_numbers<[1], [0], [0], [1], [0, 0, 1, 1], [], []>} : vector<16x128xf32>, vector<128x128xf32>, vector<16x128xf32> -> vector<16x128xf32>
    %c0_3 = arith.constant 0 : index
    %c0_4 = arith.constant 0 : index
    %8 = vector.load %arg4[%c0_3, %c0_4] : memref<16x128xf32, #tpu.memory_space<vmem>>, vector<16x128xf32>
    tpu.vector_store %arg4[%c0_3, %c0_4], %7 {strides = array<i32>} : memref<16x128xf32, #tpu.memory_space<vmem>>, vector<16x128xf32>,
    %c0_5 = arith.constant 0 : index
    %c0_6 = arith.constant 0 : index
    %9 = vector.load %arg2[%c0_5, %c0_6] : memref<16x1xi32, #tpu.memory_space<vmem>>, vector<16x1xi32>
    %cst_7 = arith.constant dense<0xFF800000> : vector<16xf32>
    %10 = vector.multi_reduction <maximumf>, %7, %cst_7 [1] : vector<16x128xf32> to vector<16xf32>
    %11 = vector.shape_cast %10 : vector<16xf32> to vector<16x1xf32>
    %12 = vector.broadcast %11 : vector<16x1xf32> to vector<16x128xf32>
    %13 = arith.subf %7, %12 : vector<16x128xf32>
    %14 = math.exp %13 : vector<16x128xf32>
    %cst_8 = arith.constant dense<0.000000e+00> : vector<16xf32>
    %15 = vector.multi_reduction <add>, %14, %cst_8 [1] : vector<16x128xf32> to vector<16xf32>
    %16 = vector.shape_cast %15 : vector<16xf32> to vector<16x1xf32>
    %17 = math.log %16 : vector<16x1xf32>
    %18 = arith.addf %11, %17 : vector<16x1xf32>
    %19 = vector.broadcast %9 : vector<16x1xi32> to vector<16x128xi32>
    %20 = arith.cmpi eq, %0, %19 : vector<16x128xi32>
    %cst_9 = arith.constant 0.000000e+00 : f32
    %21 = vector.broadcast %cst_9 : f32 to vector<16x128xf32>
    %22 = arith.select %20, %7, %21 : vector<16x128xi1>, vector<16x128xf32>
    %cst_10 = arith.constant dense<0.000000e+00> : vector<16xf32>
    %23 = vector.multi_reduction <add>, %22, %cst_10 [1] : vector<16x128xf32> to vector<16xf32>
    %24 = vector.shape_cast %23 : vector<16xf32> to vector<16x1xf32>
    %25 = arith.subf %18, %24 : vector<16x1xf32>
    %c0_11 = arith.constant 0 : index
    %c0_12 = arith.constant 0 : index
    %26 = vector.load %arg5[%c0_11, %c0_12] : memref<16x1xf32, #tpu.memory_space<vmem>>, vector<16x1xf32>
    tpu.vector_store %arg5[%c0_11, %c0_12], %25 {strides = array<i32>} : memref<16x1xf32, #tpu.memory_space<vmem>>, vector<16x1xf32>,
    return
  }
  func.func @transform_0(%arg0: i32) -> (i32, i32) {
    %c0_i32 = arith.constant 0 : i32
    %c0_i32_0 = arith.constant 0 : i32
    return %arg0, %c0_i32 : i32, i32
  }
  func.func @transform_1(%arg0: i32) -> (i32, i32) {
    %c0_i32 = arith.constant 0 : i32
    %c0_i32_0 = arith.constant 0 : i32
    return %arg0, %c0_i32 : i32, i32
  }
  func.func @transform_2(%arg0: i32) -> (i32, i32) {
    %c0_i32 = arith.constant 0 : i32
    %c0_i32_0 = arith.constant 0 : i32
    %c0_i32_1 = arith.constant 0 : i32
    return %c0_i32, %c0_i32_0 : i32, i32
  }
  func.func @transform_3(%arg0: i32) -> (i32, i32) {
    %c0_i32 = arith.constant 0 : i32
    %c0_i32_0 = arith.constant 0 : i32
    return %arg0, %c0_i32 : i32, i32
  }
  func.func @transform_4(%arg0: i32) -> (i32, i32) {
    %c0_i32 = arith.constant 0 : i32
    %c0_i32_0 = arith.constant 0 : i32
    return %arg0, %c0_i32 : i32, i32
  }
}

</mosaic_0001>

<bundles_post_ra>
// kernel: _forward_with_target.1
= control target key start
LH: loop header
LB: loop body
LE: loop exit
PB: predicated region body
PF: predicated region fallthrough
CT: control target
= control target key end

     0   :  { %10 = vsyncpa [#allocation3], 0  ;;  %s380_s0 = inlined_call_operand.vmem [shape: s32[16,1], index: 0, kind: input, shape index: {}]   ;;  %s381_s1 = inlined_call_operand.vmem [shape: s32[16,1], index: 1, kind: input, shape index: {}]   ;;  %s382_s2 = inlined_call_operand.hbm [shape: f32[128,128], index: 2, kind: input, shape index: {}]   ;;  %s383_s3 = inlined_call_operand.hbm [shape: f32[16,128], index: 3, kind: output, shape index: {0}]   ;;  %s384_s4 = inlined_call_operand.vmem [shape: f32[16,1], index: 4, kind: output, shape index: {1}]  }
   0x1   :  { %11 = vsyncpa [#allocation4], 0  ;;  %s319_s15 = smov [#allocation2]  }
   0x2   :  { %s21_s16 = sshll.u32 %s319_s15, 4  ;;  %s22_s16 = int_to_ptr.vmem [resolvable:$true] %s21_s16 }
   0x3   :  { %s283_s17 = scalar_lea.vmem %s22_s16, 2048  ;;  %p288_p1 = scmp.lt.s32.totalorder %s22_s16, %s22_s16 }
   0x4   :  { %p284_p0 = scmp.ne.s32.totalorder %s22_s16, %s283_s17  ;;  %p289_p2 = scmp.lt.s32.totalorder %s283_s17, %s283_s17 }
   0x6   :  { %p290_p3 = por %p289_p2, %p288_p1 }
   0x8   :  { %p291_p4 = pnand %p290_p3, %p284_p0 }
   0xa   :  { %294 = shalt.err (!%p291_p4)
}
   0xb   :  { %s320_s18 = smov 128   ;;  %s321_s19 = smov 8  }
   0xc   :  { %27 = dma.hbm_to_vmem [thread:$0]  %s382_s2, 2048, %s22_s16, [#allocation3], %s320_s18, %s320_s18, %s321_s19  }
   0xd   :  { %315 = dma.done.wait [#allocation3], 2048  }
   0xe   :  { %316 = vsyncadd [#allocation3], 4294965248  ;;  %v322_v0 = vmov 0   ;;  %v33_v1 = vld [vmem:[%s380_s0] sm:$0xff]  ;;  %v62_v2 = vld [vmem:[#allocation2 + $0x78] sm:$0xff]  ;;  %v31_v20 = vlaneseq  ;;  %v323_v23 = vmov 1.0  }
   0xf   :  { %265 = vset.pattern.permute.xlu0 %v322_v0  ;;  %266 = vset.pattern.permute.xlu1 %v322_v0  ;;  %v61_v3 = vld [vmem:[#allocation2 + $0x70] sm:$0xff]  ;;  %v34_v4 = vld [vmem:[%s380_s0 + $0x8] sm:$0xff]  ;;  %v59_v6 = vld [vmem:[#allocation2 + $0x60] sm:$0xff] }
  0x10   :  { %36 = vperm.xlu0 %265, %v33_v1   ;;  %224 = vmatprep.subr.mxu0 %v62_v2  ;;  %v60_v5 = vld [vmem:[#allocation2 + $0x68] sm:$0xff]  ;;  %v140_v7 = vld [vmem:[%s381_s1] sm:$0xff]  ;;  %v58_v8 = vld [vmem:[#allocation2 + $0x58] sm:$0xff]  ;;  %v32_v21 = vand.u32 127, %v31_v20 }
  0x11   :  { %225 = vmatpush3.msra.mxu0 %v62_v2  ;;  %v57_v9 = vld [vmem:[#allocation2 + $0x50] sm:$0xff]  ;;  %v56_v10 = vld [vmem:[#allocation2 + $0x48] sm:$0xff]  ;;  %v55_v11 = vld [vmem:[#allocation2 + $0x40] sm:$0xff] }
  0x12   :  { %226 = vmatprep.subr.mxu0 %v61_v3  ;;  %v54_v12 = vld [vmem:[#allocation2 + $0x38] sm:$0xff]  ;;  %v53_v13 = vld [vmem:[#allocation2 + $0x30] sm:$0xff]  ;;  %v52_v14 = vld [vmem:[#allocation2 + $0x28] sm:$0xff] }
  0x13   :  { %227 = vmatpush3.msra.mxu0 %v61_v3  ;;  %v51_v15 = vld [vmem:[#allocation2 + $0x20] sm:$0xff]  ;;  %v50_v16 = vld [vmem:[#allocation2 + $0x18] sm:$0xff]  ;;  %v49_v17 = vld [vmem:[#allocation2 + $0x10] sm:$0xff] }
  0x14   :  { %39 = vperm.xlu0 %265, %v34_v4   ;;  %228 = vmatprep.subr.mxu0 %v60_v5  ;;  %v48_v18 = vld [vmem:[#allocation2 + $0x8] sm:$0xff]  ;;  %v47_v19 = vld [vmem:[#allocation2] sm:$0xff] }
  0x15   :  { %229 = vmatpush3.msra.mxu0 %v60_v5  ;;  %v141_v27 = vld [vmem:[%s381_s1 + $0x8] sm:$0xff]  ;;  %s324_s1 = smov [#allocation5]  }
  0x16   :  { %230 = vmatprep.subr.mxu0 %v59_v6  ;;  %s186_s28 = sshll.u32 %s324_s1, 4  ;;  %s187_s28 = int_to_ptr.vmem [resolvable:$true] %s186_s28 }
  0x17   :  { %231 = vmatpush3.msra.mxu0 %v59_v6  ;;  %s295_s29 = scalar_lea.vmem %s187_s28, 256  ;;  %p300_p6 = scmp.lt.s32.totalorder %s187_s28, %s187_s28 }
  0x18   :  { %163 = vperm.xlu0 %265, %v140_v7   ;;  %232 = vmatprep.subr.mxu0 %v58_v8  ;;  %p296_p5 = scmp.ne.s32.totalorder %s187_s28, %s295_s29  ;;  %p301_p7 = scmp.lt.s32.totalorder %s295_s29, %s295_s29 }
  0x19   :  { %233 = vmatpush3.msra.mxu0 %v58_v8 }
  0x1a   :  { %234 = vmatprep.subr.mxu0 %v57_v9  ;;  %p302_p8 = por %p301_p7, %p300_p6 }
  0x1b   :  { %235 = vmatpush3.msra.mxu0 %v57_v9 }
  0x1c   :  { %236 = vmatprep.subr.mxu0 %v56_v10  ;;  %p303_p9 = pnand %p302_p8, %p296_p5 }
  0x1d   :  { %237 = vmatpush3.msra.mxu0 %v56_v10 }
  0x1e   :  { %238 = vmatprep.subr.mxu0 %v55_v11 }
  0x1f   :  { %239 = vmatpush3.msra.mxu0 %v55_v11 }
  0x20   :  { %240 = vmatprep.subr.mxu0 %v54_v12 }
  0x21   :  { %241 = vmatpush3.msra.mxu0 %v54_v12 }
  0x22   :  { %242 = vmatprep.subr.mxu0 %v53_v13 }
  0x23   :  { %243 = vmatpush3.msra.mxu0 %v53_v13 }
  0x24   :  { %244 = vmatprep.subr.mxu0 %v52_v14 }
  0x25   :  { %245 = vmatpush3.msra.mxu0 %v52_v14 }
  0x26   :  { %246 = vmatprep.subr.mxu0 %v51_v15 }
  0x27   :  { %247 = vmatpush3.msra.mxu0 %v51_v15 }
  0x28   :  { %248 = vmatprep.subr.mxu0 %v50_v16 }
  0x29   :  { %249 = vmatpush3.msra.mxu0 %v50_v16 }
  0x2a   :  { %250 = vmatprep.subr.mxu0 %v49_v17 }
  0x2b   :  { %251 = vmatpush3.msra.mxu0 %v49_v17 }
  0x2c   :  { %252 = vmatprep.subr.mxu0 %v48_v18 }
  0x2d   :  { %253 = vmatpush3.msra.mxu0 %v48_v18 }
  0x2e   :  { %254 = vmatprep.subr.mxu0 %v47_v19 }
  0x2f   :  { %255 = vmatpush3.msra.mxu0 %v47_v19 }
  0x8b   :  { %v37_v22 = vpop.permute.xlu0 %36 }
  0x8c   :  { %vm41_vm0 = vcmp.eq.s32.totalorder %v32_v21, %v37_v22 }
  0x8d   :  { %256 = vmatprep.mubr.msk.f32.mxu0 %vm41_vm0, %v323_v23 }
  0x8f   :  { %v40_v24 = vpop.permute.xlu0 %39 }
  0x90   :  { %vm42_vm1 = vcmp.eq.s32.totalorder %v32_v21, %v40_v24 }
  0x91   :  { %257 = vmatmul.mubr.msk.f32.vlgmr.msra.gmra.mxu0 %vm42_vm1, %v323_v23 }
  0x93   :  { %v164_v35 = vpop.permute.xlu0 %163 }
  0x94   :  { %vm168_vm2 = vcmp.eq.s32.totalorder %v32_v21, %v164_v35 }
 0x151   :  { %v258_v25 = vpop.f32.mrf.mxu0 }
 0x152   :  { %139 = vst [vmem:[#allocation5 + $0x8] sm:$0xff] %v258_v25 }
 0x153   :  { %v129_v26 = vpop.f32.mrf.mxu0 }
 0x154   :  { %138 = vst [vmem:[#allocation5] sm:$0xff] %v129_v26  ;;  %142 = vmax.xlane.f32.xlu1 %v129_v26  ;;  %v170_v38 = vsel %vm168_vm2, %v129_v26, 0.0 }
 0x158   :  { %144 = vmax.xlane.f32.xlu1 %v258_v25 }
 0x169   :  { %166 = vperm.xlu1 %266, %v141_v27  }
 0x1dd   :  { %v143_v28 = vpop.xlane.xlu1 %142 }
 0x1de   :  { %v146_v29 = vsub.f32 %v129_v26, %v143_v28 }
 0x1e0   :  { %v148_v30 = vmul.f32 1.442695, %v146_v29 }
 0x1e1   :  { %v145_v31 = vpop.xlane.xlu1 %144 }
 0x1e2   :  { %267 = vpow2.f32 %v148_v30  ;;  %v147_v32 = vsub.f32 %v258_v25, %v145_v31 }
 0x1e4   :  { %v150_v33 = vmul.f32 1.442695, %v147_v32 }
 0x1e5   :  { %v167_v36 = vpop.permute.xlu1 %166 }
 0x1e6   :  { %269 = vpow2.f32 %v150_v33  ;;  %vm169_vm3 = vcmp.eq.s32.totalorder %v32_v21, %v167_v36 }
 0x1e7   :  { %v171_v39 = vsel %vm169_vm3, %v258_v25, 0.0 }
 0x1ef   :  { %v268_v34 = vpop.eup %267 }
 0x1f0   :  { %152 = vadd.xlane.f32.xlu0 %v268_v34 }
 0x1f3   :  { %v270_v37 = vpop.eup %269 }
 0x1f4   :  { %154 = vadd.xlane.f32.xlu1 %v270_v37  ;;  %172 = vadd.xlane.f32.xlu0 %v170_v38 }
 0x1f8   :  { %174 = vadd.xlane.f32.xlu0 %v171_v39 }
 0x1f9   :  { %306 = shalt.err (!%p303_p9)
}
 0x1fa   :  { %192 = dma.vmem_to_hbm [thread:$0]  %s187_s28, 256, %s383_s3, [#allocation4], %s320_s18, %s320_s18, %s321_s19   ;;  %vm178_vm4 = vcmask 7168  }
 0x279   :  { %v153_v40 = vpop.xlane.xlu0 %152 }
 0x27a   :  { %271 = vlog2.f32 %v153_v40 }
 0x27d   :  { %v155_v41 = vpop.xlane.xlu1 %154  ;;  %v173_v44 = vpop.xlane.xlu0 %172 }
 0x27e   :  { %273 = vlog2.f32 %v155_v41 }
 0x281   :  { %v175_v50 = vpop.xlane.xlu0 %174 }
 0x287   :  { %v272_v42 = vpop.eup %271 }
 0x288   :  { %v157_v43 = vmul.f32 0.6931472, %v272_v42 }
 0x28a   :  { %v160_v45 = vadd.f32 %v157_v43, %v143_v28 }
 0x28b   :  { %v274_v46 = vpop.eup %273 }
 0x28c   :  { %v159_v47 = vmul.f32 0.6931472, %v274_v46  ;;  %v176_v48 = vsub.f32 %v160_v45, %v173_v44 }
 0x28e   :  { %179 = vst.msk [vmem:[%s384_s4] sm:$0xff] %vm178_vm4, %v176_v48  ;;  %v161_v49 = vadd.f32 %v159_v47, %v145_v31 }
 0x290   :  { %v177_v51 = vsub.f32 %v161_v49, %v175_v50 }
 0x292   :  { %180 = vst.msk [vmem:[%s384_s4 + $0x8] sm:$0xff] %vm178_vm4, %v177_v51 }
 0x293   :  { %317 = dma.done.wait [#allocation4], 256  }
 0x294   :  { %318 = vsyncadd [#allocation4], 4294967040 }
 0x295   :  { %200 = vsyncpa [#allocation3], 1 }
 0x296   :  { %201 = vsyncpa [#allocation4], 1 }

</bundles_post_ra>
